<compile_context>
chip_gen: v5e
topology: v5e:2x2
jax: 0.10.0
libtpu: 0.0.40
codegen_flags: <defaults>
</compile_context>

<pallas_src>
import jax
import jax.numpy as jnp
from jax.experimental import pallas as pl
from jax.experimental.pallas import tpu as pltpu


def _round_up(n, m):
    return ((n + m - 1) // m) * m


def autoencoder_kernel(x_ref, w1_ref, b1_ref, w2_ref, b2_ref, o_ref):
    # x_ref: (in_size, S_tile, 128) VMEM block, feature-major, sublane/lane-dense per feature.
    # w1/b1/w2/b2: tiny parameter arrays resident in SMEM (scalar reads).
    # o_ref: (out_size, S_tile, 128) VMEM block of the feature-major output.
    in_size = x_ref.shape[0]
    bn_size = w1_ref.shape[0]
    out_size = w2_ref.shape[0]

    # One full (S_tile, 128) slab per input feature, loaded once each.
    x_slabs = [x_ref[i].astype(jnp.float32) for i in range(in_size)]

    # Encoder: h_j = relu(b1[j] + sum_i w1[j, i] * x_i)  -- unrolled scalar*slab FMAs on the VPU.
    h_slabs = []
    for j in range(bn_size):
        acc = w1_ref[j, 0] * x_slabs[0]
        for i in range(1, in_size):
            acc = acc + w1_ref[j, i] * x_slabs[i]
        h_slabs.append(jnp.maximum(acc + b1_ref[j], 0.0))

    # Decoder: y_k = relu(b2[k] + sum_j w2[k, j] * h_j) -- stored per-feature, no concatenate.
    for k in range(out_size):
        acc = w2_ref[k, 0] * h_slabs[0]
        for j in range(1, bn_size):
            acc = acc + w2_ref[k, j] * h_slabs[j]
        o_ref[k] = jnp.maximum(acc + b2_ref[k], 0.0).astype(o_ref.dtype)


def autoencoder_forward_fm(xt, w1, b1, w2, b2, *, block_rows=2048):
    """Feature-major forward pass (no wrapper relayouts).

    xt: (input_size, B) feature-major activations.
    w1: (bottleneck, input); b1: (bottleneck,); w2: (output, bottleneck); b2: (output,).
    Returns (output_size, B).
    """
    in_size, B = xt.shape
    bn_size = w1.shape[0]
    out_size = w2.shape[0]

    # Number of 128-lane rows needed to cover the batch.
    s_padded = _round_up(B, 128) // 128

    # Tile over the sublane-row axis: either the whole (padded) batch in one block, or a
    # multiple-of-8 row tile (keeps the (8,128) tiling constraint satisfied for any input).
    block_rows = max(8, _round_up(int(block_rows), 8))
    s_tile = s_padded if s_padded <= block_rows else block_rows
    s_total = _round_up(s_padded, s_tile)
    b_total = s_total * 128
    num_tiles = s_total // s_tile

    # (C, B) -> (C, S, 128): pure pad + reshape, each feature row stays contiguous in memory.
    xr = jnp.pad(xt, ((0, 0), (0, b_total - B))).reshape(in_size, s_total, 128)

    grid_spec = pl.GridSpec(
        grid=(num_tiles,),
        in_specs=[
            pl.BlockSpec((in_size, s_tile, 128), lambda i: (0, i, 0)),
            pl.BlockSpec(memory_space=pltpu.MemorySpace.SMEM),
            pl.BlockSpec(memory_space=pltpu.MemorySpace.SMEM),
            pl.BlockSpec(memory_space=pltpu.MemorySpace.SMEM),
            pl.BlockSpec(memory_space=pltpu.MemorySpace.SMEM),
        ],
        out_specs=pl.BlockSpec((out_size, s_tile, 128), lambda i: (0, i, 0)),
    )

    param_bytes = sum(int(a.size) * a.dtype.itemsize for a in (w1, b1, w2, b2))
    cost = pl.CostEstimate(
        flops=2 * b_total * (in_size * bn_size + bn_size * out_size),
        transcendentals=0,
        bytes_accessed=b_total * (in_size + out_size) * xt.dtype.itemsize + param_bytes,
    )

    yr = pl.pallas_call(
        autoencoder_kernel,
        out_shape=jax.ShapeDtypeStruct((out_size, s_total, 128), xt.dtype),
        grid_spec=grid_spec,
        compiler_params=pltpu.CompilerParams(dimension_semantics=("parallel",)),
        cost_estimate=cost,
    )(xr, w1, b1, w2, b2)

    return yr.reshape(out_size, b_total)[:, :B]


def autoencoder_forward(x, w1, b1, w2, b2, *, block_rows=2048):
    """PyTorch-layout convenience wrapper: x (B, input_size) -> (B, output_size).

    Prefer `autoencoder_forward_fm` with feature-major activations end-to-end to avoid the
    boundary transposes of a purely bandwidth-bound op.
    """
    yt = autoencoder_forward_fm(x.T, w1, b1, w2, b2, block_rows=block_rows)
    return yt.T


def init_params(key, input_size=3, bottleneck_size=2, output_size=3):
    """Deterministic init mimicking nn.Linear's U(-1/sqrt(fan_in), 1/sqrt(fan_in)).
    Weights use the PyTorch (out_features, in_features) convention."""
    k1, k2, k3, k4 = jax.random.split(key, 4)
    bound1 = 1.0 / jnp.sqrt(input_size)
    bound2 = 1.0 / jnp.sqrt(bottleneck_size)
    w1 = jax.random.uniform(k1, (bottleneck_size, input_size), jnp.float32, -bound1, bound1)
    b1 = jax.random.uniform(k2, (bottleneck_size,), jnp.float32, -bound1, bound1)
    w2 = jax.random.uniform(k3, (output_size, bottleneck_size), jnp.float32, -bound2, bound2)
    b2 = jax.random.uniform(k4, (output_size,), jnp.float32, -bound2, bound2)
    return w1, b1, w2, b2


if __name__ == "__main__":
    key = jax.random.PRNGKey(0)
    k_param, k_x = jax.random.split(key)

    input_size, bottleneck_size, output_size = 3, 2, 3
    batch = 8

    w1, b1, w2, b2 = init_params(k_param, input_size, bottleneck_size, output_size)
    x = jax.random.normal(k_x, (batch, input_size), dtype=jnp.float32)

    out = autoencoder_forward(x, w1, b1, w2, b2)
    out = jax.block_until_ready(out)

    # Pure-JAX reference of the same forward pass (PyTorch nn.Linear semantics).
    h_ref = jnp.maximum(x @ w1.T + b1, 0.0)
    y_ref = jnp.maximum(h_ref @ w2.T + b2, 0.0)
    assert out.shape == (batch, output_size)
    assert jnp.allclose(out, y_ref, atol=1e-5, rtol=1e-5)

    # Also exercise the zero-relayout feature-major path.
    out_fm = jax.block_until_ready(autoencoder_forward_fm(x.T, w1, b1, w2, b2))
    assert jnp.allclose(out_fm, y_ref.T, atol=1e-5, rtol=1e-5)

    print("KERNEL_OK")
</pallas_src>

<mosaic_0001>
module attributes {stable_mosaic.version = 11 : i64} {
  func.func @autoencoder_kernel(%arg0: i32, %arg1: memref<3x1x128xf32, #tpu.memory_space<vmem>>, %arg2: memref<2x3xf32, #tpu.memory_space<smem>>, %arg3: memref<2xf32, #tpu.memory_space<smem>>, %arg4: memref<3x2xf32, #tpu.memory_space<smem>>, %arg5: memref<3xf32, #tpu.memory_space<smem>>, %arg6: memref<3x1x128xf32, #tpu.memory_space<vmem>>) attributes {dimension_semantics = [#tpu.dimension_semantics<parallel>], iteration_bounds = array<i64: 1>, scalar_prefetch = 0 : i64, scratch_operands = 0 : i64, tpu.core_type = #tpu.core_type<tc>, window_params = [{transform_indices = @transform_0, window_bounds = array<i64: 3, 1, 128>}, {transform_indices = @transform_1, window_bounds = array<i64: 2, 3>}, {transform_indices = @transform_2, window_bounds = array<i64: 2>}, {transform_indices = @transform_3, window_bounds = array<i64: 3, 2>}, {transform_indices = @transform_4, window_bounds = array<i64: 3>}, {transform_indices = @transform_5, window_bounds = array<i64: 3, 1, 128>}]} {
    %c0 = arith.constant 0 : index
    %c0_0 = arith.constant 0 : index
    %c0_1 = arith.constant 0 : index
    %0 = vector.load %arg1[%c0, %c0_0, %c0_1] : memref<3x1x128xf32, #tpu.memory_space<vmem>>, vector<1x1x128xf32>
    %1 = vector.shape_cast %0 : vector<1x1x128xf32> to vector<1x128xf32>
    %c1 = arith.constant 1 : index
    %c0_2 = arith.constant 0 : index
    %c0_3 = arith.constant 0 : index
    %2 = vector.load %arg1[%c1, %c0_2, %c0_3] : memref<3x1x128xf32, #tpu.memory_space<vmem>>, vector<1x1x128xf32>
    %3 = vector.shape_cast %2 : vector<1x1x128xf32> to vector<1x128xf32>
    %c2 = arith.constant 2 : index
    %c0_4 = arith.constant 0 : index
    %c0_5 = arith.constant 0 : index
    %4 = vector.load %arg1[%c2, %c0_4, %c0_5] : memref<3x1x128xf32, #tpu.memory_space<vmem>>, vector<1x1x128xf32>
    %5 = vector.shape_cast %4 : vector<1x1x128xf32> to vector<1x128xf32>
    %c0_6 = arith.constant 0 : index
    %c0_7 = arith.constant 0 : index
    %6 = memref.load %arg2[%c0_6, %c0_7] : memref<2x3xf32, #tpu.memory_space<smem>>
    %7 = vector.broadcast %6 : f32 to vector<1x128xf32>
    %8 = arith.mulf %7, %1 : vector<1x128xf32>
    %c0_8 = arith.constant 0 : index
    %c1_9 = arith.constant 1 : index
    %9 = memref.load %arg2[%c0_8, %c1_9] : memref<2x3xf32, #tpu.memory_space<smem>>
    %10 = vector.broadcast %9 : f32 to vector<1x128xf32>
    %11 = arith.mulf %10, %3 : vector<1x128xf32>
    %12 = arith.addf %8, %11 : vector<1x128xf32>
    %c0_10 = arith.constant 0 : index
    %c2_11 = arith.constant 2 : index
    %13 = memref.load %arg2[%c0_10, %c2_11] : memref<2x3xf32, #tpu.memory_space<smem>>
    %14 = vector.broadcast %13 : f32 to vector<1x128xf32>
    %15 = arith.mulf %14, %5 : vector<1x128xf32>
    %16 = arith.addf %12, %15 : vector<1x128xf32>
    %c0_12 = arith.constant 0 : index
    %17 = memref.load %arg3[%c0_12] : memref<2xf32, #tpu.memory_space<smem>>
    %18 = vector.broadcast %17 : f32 to vector<1x128xf32>
    %19 = arith.addf %16, %18 : vector<1x128xf32>
    %cst = arith.constant 0.000000e+00 : f32
    %20 = vector.broadcast %cst : f32 to vector<1x128xf32>
    %21 = arith.maximumf %19, %20 : vector<1x128xf32>
    %c1_13 = arith.constant 1 : index
    %c0_14 = arith.constant 0 : index
    %22 = memref.load %arg2[%c1_13, %c0_14] : memref<2x3xf32, #tpu.memory_space<smem>>
    %23 = vector.broadcast %22 : f32 to vector<1x128xf32>
    %24 = arith.mulf %23, %1 : vector<1x128xf32>
    %c1_15 = arith.constant 1 : index
    %c1_16 = arith.constant 1 : index
    %25 = memref.load %arg2[%c1_15, %c1_16] : memref<2x3xf32, #tpu.memory_space<smem>>
    %26 = vector.broadcast %25 : f32 to vector<1x128xf32>
    %27 = arith.mulf %26, %3 : vector<1x128xf32>
    %28 = arith.addf %24, %27 : vector<1x128xf32>
    %c1_17 = arith.constant 1 : index
    %c2_18 = arith.constant 2 : index
    %29 = memref.load %arg2[%c1_17, %c2_18] : memref<2x3xf32, #tpu.memory_space<smem>>
    %30 = vector.broadcast %29 : f32 to vector<1x128xf32>
    %31 = arith.mulf %30, %5 : vector<1x128xf32>
    %32 = arith.addf %28, %31 : vector<1x128xf32>
    %c1_19 = arith.constant 1 : index
    %33 = memref.load %arg3[%c1_19] : memref<2xf32, #tpu.memory_space<smem>>
    %34 = vector.broadcast %33 : f32 to vector<1x128xf32>
    %35 = arith.addf %32, %34 : vector<1x128xf32>
    %cst_20 = arith.constant 0.000000e+00 : f32
    %36 = vector.broadcast %cst_20 : f32 to vector<1x128xf32>
    %37 = arith.maximumf %35, %36 : vector<1x128xf32>
    %c0_21 = arith.constant 0 : index
    %c0_22 = arith.constant 0 : index
    %38 = memref.load %arg4[%c0_21, %c0_22] : memref<3x2xf32, #tpu.memory_space<smem>>
    %39 = vector.broadcast %38 : f32 to vector<1x128xf32>
    %40 = arith.mulf %39, %21 : vector<1x128xf32>
    %c0_23 = arith.constant 0 : index
    %c1_24 = arith.constant 1 : index
    %41 = memref.load %arg4[%c0_23, %c1_24] : memref<3x2xf32, #tpu.memory_space<smem>>
    %42 = vector.broadcast %41 : f32 to vector<1x128xf32>
    %43 = arith.mulf %42, %37 : vector<1x128xf32>
    %44 = arith.addf %40, %43 : vector<1x128xf32>
    %c0_25 = arith.constant 0 : index
    %45 = memref.load %arg5[%c0_25] : memref<3xf32, #tpu.memory_space<smem>>
    %46 = vector.broadcast %45 : f32 to vector<1x128xf32>
    %47 = arith.addf %44, %46 : vector<1x128xf32>
    %cst_26 = arith.constant 0.000000e+00 : f32
    %48 = vector.broadcast %cst_26 : f32 to vector<1x128xf32>
    %49 = arith.maximumf %47, %48 : vector<1x128xf32>
    %c0_27 = arith.constant 0 : index
    %c0_28 = arith.constant 0 : index
    %c0_29 = arith.constant 0 : index
    %50 = vector.load %arg6[%c0_27, %c0_28, %c0_29] : memref<3x1x128xf32, #tpu.memory_space<vmem>>, vector<1x1x128xf32>
    %51 = vector.shape_cast %50 : vector<1x1x128xf32> to vector<1x128xf32>
    %52 = vector.shape_cast %49 : vector<1x128xf32> to vector<1x1x128xf32>
    tpu.vector_store %arg6[%c0_27, %c0_28, %c0_29], %52 {strides = array<i32>} : memref<3x1x128xf32, #tpu.memory_space<vmem>>, vector<1x1x128xf32>,
    %c1_30 = arith.constant 1 : index
    %c0_31 = arith.constant 0 : index
    %53 = memref.load %arg4[%c1_30, %c0_31] : memref<3x2xf32, #tpu.memory_space<smem>>
    %54 = vector.broadcast %53 : f32 to vector<1x128xf32>
    %55 = arith.mulf %54, %21 : vector<1x128xf32>
    %c1_32 = arith.constant 1 : index
    %c1_33 = arith.constant 1 : index
    %56 = memref.load %arg4[%c1_32, %c1_33] : memref<3x2xf32, #tpu.memory_space<smem>>
    %57 = vector.broadcast %56 : f32 to vector<1x128xf32>
    %58 = arith.mulf %57, %37 : vector<1x128xf32>
    %59 = arith.addf %55, %58 : vector<1x128xf32>
    %c1_34 = arith.constant 1 : index
    %60 = memref.load %arg5[%c1_34] : memref<3xf32, #tpu.memory_space<smem>>
    %61 = vector.broadcast %60 : f32 to vector<1x128xf32>
    %62 = arith.addf %59, %61 : vector<1x128xf32>
    %cst_35 = arith.constant 0.000000e+00 : f32
    %63 = vector.broadcast %cst_35 : f32 to vector<1x128xf32>
    %64 = arith.maximumf %62, %63 : vector<1x128xf32>
    %c1_36 = arith.constant 1 : index
    %c0_37 = arith.constant 0 : index
    %c0_38 = arith.constant 0 : index
    %65 = vector.load %arg6[%c1_36, %c0_37, %c0_38] : memref<3x1x128xf32, #tpu.memory_space<vmem>>, vector<1x1x128xf32>
    %66 = vector.shape_cast %65 : vector<1x1x128xf32> to vector<1x128xf32>
    %67 = vector.shape_cast %64 : vector<1x128xf32> to vector<1x1x128xf32>
    tpu.vector_store %arg6[%c1_36, %c0_37, %c0_38], %67 {strides = array<i32>} : memref<3x1x128xf32, #tpu.memory_space<vmem>>, vector<1x1x128xf32>,
    %c2_39 = arith.constant 2 : index
    %c0_40 = arith.constant 0 : index
    %68 = memref.load %arg4[%c2_39, %c0_40] : memref<3x2xf32, #tpu.memory_space<smem>>
    %69 = vector.broadcast %68 : f32 to vector<1x128xf32>
    %70 = arith.mulf %69, %21 : vector<1x128xf32>
    %c2_41 = arith.constant 2 : index
    %c1_42 = arith.constant 1 : index
    %71 = memref.load %arg4[%c2_41, %c1_42] : memref<3x2xf32, #tpu.memory_space<smem>>
    %72 = vector.broadcast %71 : f32 to vector<1x128xf32>
    %73 = arith.mulf %72, %37 : vector<1x128xf32>
    %74 = arith.addf %70, %73 : vector<1x128xf32>
    %c2_43 = arith.constant 2 : index
    %75 = memref.load %arg5[%c2_43] : memref<3xf32, #tpu.memory_space<smem>>
    %76 = vector.broadcast %75 : f32 to vector<1x128xf32>
    %77 = arith.addf %74, %76 : vector<1x128xf32>
    %cst_44 = arith.constant 0.000000e+00 : f32
    %78 = vector.broadcast %cst_44 : f32 to vector<1x128xf32>
    %79 = arith.maximumf %77, %78 : vector<1x128xf32>
    %c2_45 = arith.constant 2 : index
    %c0_46 = arith.constant 0 : index
    %c0_47 = arith.constant 0 : index
    %80 = vector.load %arg6[%c2_45, %c0_46, %c0_47] : memref<3x1x128xf32, #tpu.memory_space<vmem>>, vector<1x1x128xf32>
    %81 = vector.shape_cast %80 : vector<1x1x128xf32> to vector<1x128xf32>
    %82 = vector.shape_cast %79 : vector<1x128xf32> to vector<1x1x128xf32>
    tpu.vector_store %arg6[%c2_45, %c0_46, %c0_47], %82 {strides = array<i32>} : memref<3x1x128xf32, #tpu.memory_space<vmem>>, vector<1x1x128xf32>,
    return
  }
  func.func @transform_0(%arg0: i32) -> (i32, i32, i32) {
    %c0_i32 = arith.constant 0 : i32
    %c0_i32_0 = arith.constant 0 : i32
    %c0_i32_1 = arith.constant 0 : i32
    return %c0_i32, %arg0, %c0_i32_0 : i32, i32, i32
  }
  func.func @transform_1(%arg0: i32) -> (i32, i32) {
    %c0_i32 = arith.constant 0 : i32
    %c0_i32_0 = arith.constant 0 : i32
    %c0_i32_1 = arith.constant 0 : i32
    return %c0_i32, %c0_i32_0 : i32, i32
  }
  func.func @transform_2(%arg0: i32) -> i32 {
    %c0_i32 = arith.constant 0 : i32
    %c0_i32_0 = arith.constant 0 : i32
    return %c0_i32 : i32
  }
  func.func @transform_3(%arg0: i32) -> (i32, i32) {
    %c0_i32 = arith.constant 0 : i32
    %c0_i32_0 = arith.constant 0 : i32
    %c0_i32_1 = arith.constant 0 : i32
    return %c0_i32, %c0_i32_0 : i32, i32
  }
  func.func @transform_4(%arg0: i32) -> i32 {
    %c0_i32 = arith.constant 0 : i32
    %c0_i32_0 = arith.constant 0 : i32
    return %c0_i32 : i32
  }
  func.func @transform_5(%arg0: i32) -> (i32, i32, i32) {
    %c0_i32 = arith.constant 0 : i32
    %c0_i32_0 = arith.constant 0 : i32
    %c0_i32_1 = arith.constant 0 : i32
    return %c0_i32, %arg0, %c0_i32_0 : i32, i32, i32
  }
}

</mosaic_0001>

<bundles_post_ra>
// kernel: tpu_custom_call.1
= control target key start
LH: loop header
LB: loop body
LE: loop exit
PB: predicated region body
PF: predicated region fallthrough
CT: control target
= control target key end

     0   :  { %10 = vsyncpa [#allocation4], 0  ;;  %s332_s0 = inlined_call_operand.vmem [shape: f32[3,1,128], index: 0, kind: input, shape index: {}]   ;;  %s333_s1 = inlined_call_operand.vmem [shape: f32[2,3], index: 1, kind: input, shape index: {}]   ;;  %s334_s2 = inlined_call_operand.vmem [shape: f32[2], index: 2, kind: input, shape index: {}]   ;;  %s335_s3 = inlined_call_operand.vmem [shape: f32[3,2], index: 3, kind: input, shape index: {}]   ;;  %s336_s4 = inlined_call_operand.vmem [shape: f32[3], index: 4, kind: input, shape index: {}]   ;;  %s337_s5 = inlined_call_operand.hbm [shape: f32[3,1,128], index: 5, kind: output, shape index: {}]  }
   0x1   :  { %11 = vsyncpa [#allocation6], 0 }
   0x2   :  { %12 = vsyncpa [#allocation9], 0  ;;  %s30_s20 = sshll.u32 %s334_s2, 4  ;;  %s31_s20 = int_to_ptr.vmem [resolvable:$true] %s30_s20 }
   0x3   :  { %13 = vsyncpa [#allocation3], 0  ;;  %s21_s23 = sshll.u32 %s333_s1, 4  ;;  %s265_s24 = smov [#allocation5]   ;;  %s22_s23 = int_to_ptr.vmem [resolvable:$true] %s21_s23 }
   0x4   :  { %33 = dma.vmem_to_smem %s31_s20, 16, %s265_s24, [#allocation6]  }
   0x5   :  { %s266_s25 = smov [#allocation2]   ;;  %s39_s28 = sshll.u32 %s335_s3, 4  ;;  %s40_s28 = int_to_ptr.vmem [resolvable:$true] %s39_s28 }
   0x6   :  { %24 = dma.vmem_to_smem %s22_s23, 32, %s266_s25, [#allocation4]  }
   0x7   :  { %s48_s2 = sshll.u32 %s336_s4, 4  ;;  %s267_s6 = smov [#allocation7]   ;;  %s49_s2 = int_to_ptr.vmem [resolvable:$true] %s48_s2 }
   0x8   :  { %42 = dma.vmem_to_smem %s40_s28, 64, %s267_s6, [#allocation6]  }
   0x9   :  { %s268_s7 = smov [#allocation8]  }
   0xa   :  { %51 = dma.vmem_to_smem %s49_s2, 16, %s268_s7, [#allocation9]  }
   0xb   :  { %257 = dma.done.wait [#allocation4], 32  }
   0xc   :  { %258 = vsyncadd [#allocation4], 4294967264 }
   0xd   :  { %259 = dma.done.wait [#allocation6], 80  }
   0xe   :  { %260 = vsyncadd [#allocation6], 4294967216 }
   0xf   :  { %261 = dma.done.wait [#allocation9], 16  }
  0x10   :  { %262 = vsyncadd [#allocation9], 4294967280 }
  0x11   :  { %68 = sfence }
  0x12   :  { %s74_s1 = sld [smem:[#allocation2]]  ;;  %v69_v0 = vld [vmem:[%s332_s0] sm:$0x1]  ;;  %v163_v1 = vld [vmem:[%s332_s0 + $0x1] sm:$0x1]  ;;  %s269_s27 = smov [#allocation10]  }
  0x13   :  { %s165_s8 = sld [smem:[#allocation2 + $0x1]]  ;;  %v164_v2 = vld [vmem:[%s332_s0 + $0x2] sm:$0x1]  ;;  %s146_s28 = sshll.u32 %s269_s27, 4  ;;  %s147_s28 = int_to_ptr.vmem [resolvable:$true] %s146_s28 }
  0x14   :  { %s166_s3 = sld [smem:[#allocation2 + $0x2]]  ;;  %s148_s2 = sshll.u32 %s337_s5, 4  ;;  %s149_s2 = int_to_ptr.hbm [resolvable:$true] %s148_s2 }
  0x15   :  { %s85_s9 = sld [smem:[#allocation5]]  ;;  %s270_s6 = smov 16  }
  0x16   :  { %s167_s4 = sld [smem:[#allocation2 + $0x80]]  ;;  %s271_s7 = smov 1  }
  0x17   :  { %s168_s14 = sld [smem:[#allocation2 + $0x81]] }
  0x18   :  { %v75_v3 = vstv %s74_s1  ;;  %s169_s17 = sld [smem:[#allocation2 + $0x82]] }
  0x19   :  { %v76_v4 = vmul.f32 %v75_v3, %v69_v0  ;;  %v78_v5 = vstv %s165_s8  ;;  %s170_s18 = sld [smem:[#allocation5 + $0x1]] }
  0x1a   :  { %v79_v6 = vmul.f32 %v163_v1, %v78_v5  ;;  %v82_v7 = vstv %s166_s3  ;;  %s104_s19 = sld [smem:[#allocation7]] }
  0x1b   :  { %v83_v8 = vmul.f32 %v164_v2, %v82_v7  ;;  %s323_s20 = sld [smem:[#allocation7 + $0x1]]  ;;  %v86_v11 = vstv %s85_s9 }
  0x1c   :  { %v80_v9 = vadd.f32 %v79_v6, %v76_v4  ;;  %v90_v10 = vstv %s167_s4  ;;  %s325_s21 = sld [smem:[#allocation8]] }
  0x1d   :  { %v91_v12 = vmul.f32 %v90_v10, %v69_v0  ;;  %v93_v13 = vstv %s168_s14  ;;  %s172_s22 = sld [smem:[#allocation7 + $0x80]] }
  0x1e   :  { %v84_v14 = vadd.f32 %v83_v8, %v80_v9  ;;  %v94_v15 = vmul.f32 %v163_v1, %v93_v13  ;;  %v97_v16 = vstv %s169_s17  ;;  %s173_s0 = sld [smem:[#allocation7 + $0x81]] }
  0x1f   :  { %v98_v17 = vmul.f32 %v164_v2, %v97_v16  ;;  %s174_s23 = sld [smem:[#allocation8 + $0x1]]  ;;  %v101_v20 = vstv %s170_s18 }
  0x20   :  { %v87_v18 = vadd.f32 %v86_v11, %v84_v14  ;;  %v95_v19 = vadd.f32 %v94_v15, %v91_v12  ;;  %s175_s24 = sld [smem:[#allocation7 + $0x100]]  ;;  %v105_v23 = vstv %s104_s19 }
  0x21   :  { %s176_s25 = sld [smem:[#allocation7 + $0x101]]  ;;  %v108_v26 = vstv %s323_s20 }
  0x22   :  { %v88_v21 = vmax.f32 %v87_v18, 0.0  ;;  %v99_v22 = vadd.f32 %v98_v17, %v95_v19  ;;  %s177_s26 = sld [smem:[#allocation8 + $0x2]]  ;;  %v112_v37 = vstv %s325_s21 }
  0x23   :  { %v117_v24 = vstv %s172_s22 }
  0x24   :  { %v102_v25 = vadd.f32 %v101_v20, %v99_v22  ;;  %v120_v27 = vstv %s173_s0  ;;  %v106_v29 = vmul.f32 %v105_v23, %v88_v21  ;;  %v118_v30 = vmul.f32 %v117_v24, %v88_v21 }
  0x25   :  { %v124_v38 = vstv %s174_s23 }
  0x26   :  { %v103_v28 = vmax.f32 %v102_v25, 0.0  ;;  %v130_v31 = vstv %s175_s24 }
  0x27   :  { %v131_v32 = vmul.f32 %v130_v31, %v88_v21  ;;  %v133_v33 = vstv %s176_s25 }
  0x28   :  { %v109_v34 = vmul.f32 %v108_v26, %v103_v28  ;;  %v121_v35 = vmul.f32 %v120_v27, %v103_v28  ;;  %v134_v36 = vmul.f32 %v133_v33, %v103_v28  ;;  %v137_v39 = vstv %s177_s26 }
  0x2a   :  { %v110_v40 = vadd.f32 %v109_v34, %v106_v29  ;;  %v122_v41 = vadd.f32 %v121_v35, %v118_v30  ;;  %v135_v42 = vadd.f32 %v134_v36, %v131_v32 }
  0x2c   :  { %v113_v43 = vadd.f32 %v112_v37, %v110_v40  ;;  %v125_v44 = vadd.f32 %v124_v38, %v122_v41  ;;  %v138_v45 = vadd.f32 %v137_v39, %v135_v42 }
  0x2e   :  { %v114_v46 = vmax.f32 %v113_v43, 0.0  ;;  %v126_v47 = vmax.f32 %v125_v44, 0.0  ;;  %v139_v48 = vmax.f32 %v138_v45, 0.0 }
  0x30   :  { %115 = vst [vmem:[#allocation10] sm:$0x1] %v114_v46 }
  0x31   :  { %128 = vst [vmem:[#allocation10 + $0x1] sm:$0x1] %v126_v47 }
  0x32   :  { %141 = vst [vmem:[#allocation10 + $0x2] sm:$0x1] %v139_v48 }
  0x33   :  { %154 = dma.vmem_to_hbm [thread:$0]  %s147_s28, 48, %s149_s2, [#allocation3], %s270_s6, %s270_s6, %s271_s7  }
  0x34   :  { %263 = dma.done.wait [#allocation3], 48  }
  0x35   :  { %264 = vsyncadd [#allocation3], 4294967248 }
  0x36   :  { %159 = vsyncpa [#allocation3], 1 }
  0x37   :  { %160 = vsyncpa [#allocation4], 1 }
  0x38   :  { %161 = vsyncpa [#allocation6], 1 }
  0x39   :  { %162 = vsyncpa [#allocation9], 1 }

</bundles_post_ra>
